<compile_context>
chip_gen: v5e
topology: v5e:2x2
jax: 0.10.0
libtpu: 0.0.40
codegen_flags: <defaults>
</compile_context>

<pallas_src>
import jax
import jax.numpy as jnp
from jax.experimental import pallas as pl
from jax.experimental.pallas import tpu as pltpu


def _round_up(x: int, m: int) -> int:
    return ((x + m - 1) // m) * m


def qnet_kernel(x_ref, w1_ref, b1_ref, w2_ref, b2_ref, w3_ref, b3_ref, o_ref):
    # x_ref: (tb, S) batch tile; w*_ref: (in, out) resident weights; b*_ref: (1, out).
    x = x_ref[...]
    # MXU matmuls with f32 accumulation. Activations are cast to the weight dtype
    # only for the matmul inputs; bias add + ReLU stay in f32 (v5e-friendly).
    h1 = jnp.dot(x.astype(w1_ref.dtype), w1_ref[...],
                 preferred_element_type=jnp.float32)
    h1 = jnp.maximum(h1 + b1_ref[...], 0.0)
    h2 = jnp.dot(h1.astype(w2_ref.dtype), w2_ref[...],
                 preferred_element_type=jnp.float32)
    h2 = jnp.maximum(h2 + b2_ref[...], 0.0)
    out = jnp.dot(h2.astype(w3_ref.dtype), w3_ref[...],
                  preferred_element_type=jnp.float32)
    o_ref[...] = (out + b3_ref[...]).astype(o_ref.dtype)


def qnetwork_forward(state, params, *, tb=256, weight_dtype=jnp.float32):
    """state: (B, state_size) float32; params: dict of w1,b1,w2,b2,w3,b3.

    Returns (B, action_size) float32 Q-values (same math as the PyTorch module).
    """
    w1, b1, w2, b2, w3, b3 = (params[k] for k in ("w1", "b1", "w2", "b2", "w3", "b3"))
    B, S = state.shape
    F1 = w1.shape[1]
    F2 = w2.shape[1]
    A = w3.shape[1]

    # Lane-dense padding: every feature (lane) dim becomes a multiple of 128.
    F1p = _round_up(F1, 128)
    F2p = _round_up(F2, 128)
    Ap = _round_up(A, 128)

    # Batch tiling: round the tile to a sublane multiple, never bigger than the
    # (padded) batch, and pad the batch up to a whole number of tiles.
    tb = max(8, min(_round_up(tb, 8), _round_up(B, 8)))
    num_tiles = pl.cdiv(B, tb)
    Bp = num_tiles * tb

    f32 = jnp.float32
    state_p = jnp.pad(state.astype(f32), ((0, Bp - B), (0, 0)))
    w1p = jnp.pad(w1.astype(weight_dtype), ((0, 0), (0, F1p - F1)))
    b1p = jnp.pad(b1.astype(f32), ((0, 0), (0, F1p - F1)))
    w2p = jnp.pad(w2.astype(weight_dtype), ((0, F1p - F1), (0, F2p - F2)))
    b2p = jnp.pad(b2.astype(f32), ((0, 0), (0, F2p - F2)))
    w3p = jnp.pad(w3.astype(weight_dtype), ((0, F2p - F2), (0, Ap - A)))
    b3p = jnp.pad(b3.astype(f32), ((0, 0), (0, Ap - A)))

    wbytes = sum(int(a.size) * a.dtype.itemsize
                 for a in (w1p, b1p, w2p, b2p, w3p, b3p))
    cost = pl.CostEstimate(
        flops=2 * Bp * (S * F1p + F1p * F2p + F2p * Ap),
        transcendentals=0,
        bytes_accessed=int(state_p.size) * 4 + Bp * Ap * 4 + wbytes,
    )

    out = pl.pallas_call(
        qnet_kernel,
        out_shape=jax.ShapeDtypeStruct((Bp, Ap), jnp.float32),
        grid_spec=pltpu.PrefetchScalarGridSpec(
            num_scalar_prefetch=0,
            grid=(num_tiles,),
            in_specs=[
                pl.BlockSpec((tb, S), lambda i: (i, 0)),      # x: tiled over batch
                pl.BlockSpec((S, F1p), lambda i: (0, 0)),     # w1 (resident)
                pl.BlockSpec((1, F1p), lambda i: (0, 0)),     # b1
                pl.BlockSpec((F1p, F2p), lambda i: (0, 0)),   # w2
                pl.BlockSpec((1, F2p), lambda i: (0, 0)),     # b2
                pl.BlockSpec((F2p, Ap), lambda i: (0, 0)),    # w3
                pl.BlockSpec((1, Ap), lambda i: (0, 0)),      # b3
            ],
            out_specs=pl.BlockSpec((tb, Ap), lambda i: (i, 0)),
        ),
        compiler_params=pltpu.CompilerParams(
            dimension_semantics=("parallel",),
        ),
        cost_estimate=cost,
    )(state_p, w1p, b1p, w2p, b2p, w3p, b3p)

    # Drop batch padding and the lane padding of the action dim.
    return out[:B, :A]


def init_qnetwork_params(key, state_size, action_size, fc1_units=64, fc2_units=64):
    """Deterministic init mimicking PyTorch nn.Linear default: U(-1/sqrt(fan_in), 1/sqrt(fan_in))."""
    def linear(key, fan_in, fan_out):
        kw, kb = jax.random.split(key)
        bound = 1.0 / jnp.sqrt(fan_in)
        w = jax.random.uniform(kw, (fan_in, fan_out), jnp.float32, -bound, bound)
        b = jax.random.uniform(kb, (1, fan_out), jnp.float32, -bound, bound)
        return w, b

    k1, k2, k3 = jax.random.split(key, 3)
    w1, b1 = linear(k1, state_size, fc1_units)
    w2, b2 = linear(k2, fc1_units, fc2_units)
    w3, b3 = linear(k3, fc2_units, action_size)
    return {"w1": w1, "b1": b1, "w2": w2, "b2": b2, "w3": w3, "b3": b3}


if __name__ == "__main__":
    key = jax.random.PRNGKey(0)
    kp, kx = jax.random.split(key)

    state_size, action_size = 16, 4
    batch = 20  # deliberately NOT a multiple of 8 to exercise the ragged-batch path

    params = init_qnetwork_params(kp, state_size, action_size, fc1_units=64, fc2_units=64)
    state = jax.random.normal(kx, (batch, state_size), jnp.float32)

    # Pure-JAX reference of the same math as the PyTorch module.
    h1 = jnp.maximum(state @ params["w1"] + params["b1"], 0.0)
    h2 = jnp.maximum(h1 @ params["w2"] + params["b2"], 0.0)
    ref = h2 @ params["w3"] + params["b3"]

    # 1) Default config: whole (padded) batch as one lane-dense block.
    out = jax.block_until_ready(qnetwork_forward(state, params))
    assert out.shape == (batch, action_size)
    assert jnp.allclose(out, ref, atol=1e-5, rtol=1e-5), "f32 mismatch vs JAX reference"

    # 2) Multi-step grid path (several batch tiles -> parallel grid steps).
    out_tiled = jax.block_until_ready(qnetwork_forward(state, params, tb=8))
    assert jnp.allclose(out_tiled, ref, atol=1e-5, rtol=1e-5), "tiled mismatch vs JAX reference"

    # 3) bf16 weights on the MXU (recommended on v6e/v7x), f32 accumulation/elementwise.
    out_bf16 = jax.block_until_ready(
        qnetwork_forward(state, params, weight_dtype=jnp.bfloat16))
    assert jnp.allclose(out_bf16, ref, atol=5e-2, rtol=5e-2), "bf16 mismatch vs JAX reference"

    print("KERNEL_OK")
</pallas_src>

<mosaic_0001>
module attributes {stable_mosaic.version = 11 : i64} {
  func.func @qnet_kernel(%arg0: i32, %arg1: memref<24x16xf32, #tpu.memory_space<vmem>>, %arg2: memref<16x128xf32, #tpu.memory_space<vmem>>, %arg3: memref<1x128xf32, #tpu.memory_space<vmem>>, %arg4: memref<128x128xf32, #tpu.memory_space<vmem>>, %arg5: memref<1x128xf32, #tpu.memory_space<vmem>>, %arg6: memref<128x128xf32, #tpu.memory_space<vmem>>, %arg7: memref<1x128xf32, #tpu.memory_space<vmem>>, %arg8: memref<24x128xf32, #tpu.memory_space<vmem>>) attributes {dimension_semantics = [#tpu.dimension_semantics<parallel>], iteration_bounds = array<i64: 1>, scalar_prefetch = 0 : i64, scratch_operands = 0 : i64, tpu.core_type = #tpu.core_type<tc>, window_params = [{transform_indices = @transform_0, window_bounds = array<i64: 24, 16>}, {pipeline_mode = #tpu.pipeline_mode<synchronous>, transform_indices = @transform_1, window_bounds = array<i64: 16, 128>}, {pipeline_mode = #tpu.pipeline_mode<synchronous>, transform_indices = @transform_2, window_bounds = array<i64: 1, 128>}, {pipeline_mode = #tpu.pipeline_mode<synchronous>, transform_indices = @transform_3, window_bounds = array<i64: 128, 128>}, {pipeline_mode = #tpu.pipeline_mode<synchronous>, transform_indices = @transform_4, window_bounds = array<i64: 1, 128>}, {pipeline_mode = #tpu.pipeline_mode<synchronous>, transform_indices = @transform_5, window_bounds = array<i64: 128, 128>}, {pipeline_mode = #tpu.pipeline_mode<synchronous>, transform_indices = @transform_6, window_bounds = array<i64: 1, 128>}, {transform_indices = @transform_7, window_bounds = array<i64: 24, 128>}]} {
    %c0 = arith.constant 0 : index
    %c0_0 = arith.constant 0 : index
    %0 = vector.load %arg1[%c0, %c0_0] : memref<24x16xf32, #tpu.memory_space<vmem>>, vector<24x16xf32>
    %c0_1 = arith.constant 0 : index
    %c0_2 = arith.constant 0 : index
    %1 = vector.load %arg2[%c0_1, %c0_2] : memref<16x128xf32, #tpu.memory_space<vmem>>, vector<16x128xf32>
    %cst = arith.constant dense<0.000000e+00> : vector<24x128xf32>
    %2 = tpu.matmul %0, %1, %cst {dimension_numbers = #tpu.dot_dimension_numbers<[1], [0], [0], [1], [0, 0, 1, 1], [], []>} : vector<24x16xf32>, vector<16x128xf32>, vector<24x128xf32> -> vector<24x128xf32>
    %c0_3 = arith.constant 0 : index
    %c0_4 = arith.constant 0 : index
    %3 = vector.load %arg3[%c0_3, %c0_4] : memref<1x128xf32, #tpu.memory_space<vmem>>, vector<1x128xf32>
    %4 = vector.broadcast %3 : vector<1x128xf32> to vector<24x128xf32>
    %5 = arith.addf %2, %4 : vector<24x128xf32>
    %cst_5 = arith.constant 0.000000e+00 : f32
    %6 = vector.broadcast %cst_5 : f32 to vector<24x128xf32>
    %7 = arith.maximumf %5, %6 : vector<24x128xf32>
    %c0_6 = arith.constant 0 : index
    %c0_7 = arith.constant 0 : index
    %8 = vector.load %arg4[%c0_6, %c0_7] : memref<128x128xf32, #tpu.memory_space<vmem>>, vector<128x128xf32>
    %cst_8 = arith.constant dense<0.000000e+00> : vector<24x128xf32>
    %9 = tpu.matmul %7, %8, %cst_8 {dimension_numbers = #tpu.dot_dimension_numbers<[1], [0], [0], [1], [0, 0, 1, 1], [], []>} : vector<24x128xf32>, vector<128x128xf32>, vector<24x128xf32> -> vector<24x128xf32>
    %c0_9 = arith.constant 0 : index
    %c0_10 = arith.constant 0 : index
    %10 = vector.load %arg5[%c0_9, %c0_10] : memref<1x128xf32, #tpu.memory_space<vmem>>, vector<1x128xf32>
    %11 = vector.broadcast %10 : vector<1x128xf32> to vector<24x128xf32>
    %12 = arith.addf %9, %11 : vector<24x128xf32>
    %cst_11 = arith.constant 0.000000e+00 : f32
    %13 = vector.broadcast %cst_11 : f32 to vector<24x128xf32>
    %14 = arith.maximumf %12, %13 : vector<24x128xf32>
    %c0_12 = arith.constant 0 : index
    %c0_13 = arith.constant 0 : index
    %15 = vector.load %arg6[%c0_12, %c0_13] : memref<128x128xf32, #tpu.memory_space<vmem>>, vector<128x128xf32>
    %cst_14 = arith.constant dense<0.000000e+00> : vector<24x128xf32>
    %16 = tpu.matmul %14, %15, %cst_14 {dimension_numbers = #tpu.dot_dimension_numbers<[1], [0], [0], [1], [0, 0, 1, 1], [], []>} : vector<24x128xf32>, vector<128x128xf32>, vector<24x128xf32> -> vector<24x128xf32>
    %c0_15 = arith.constant 0 : index
    %c0_16 = arith.constant 0 : index
    %17 = vector.load %arg7[%c0_15, %c0_16] : memref<1x128xf32, #tpu.memory_space<vmem>>, vector<1x128xf32>
    %18 = vector.broadcast %17 : vector<1x128xf32> to vector<24x128xf32>
    %19 = arith.addf %16, %18 : vector<24x128xf32>
    %c0_17 = arith.constant 0 : index
    %c0_18 = arith.constant 0 : index
    %20 = vector.load %arg8[%c0_17, %c0_18] : memref<24x128xf32, #tpu.memory_space<vmem>>, vector<24x128xf32>
    tpu.vector_store %arg8[%c0_17, %c0_18], %19 {strides = array<i32>} : memref<24x128xf32, #tpu.memory_space<vmem>>, vector<24x128xf32>,
    return
  }
  func.func @transform_0(%arg0: i32) -> (i32, i32) {
    %c0_i32 = arith.constant 0 : i32
    %c0_i32_0 = arith.constant 0 : i32
    return %arg0, %c0_i32 : i32, i32
  }
  func.func @transform_1(%arg0: i32) -> (i32, i32) {
    %c0_i32 = arith.constant 0 : i32
    %c0_i32_0 = arith.constant 0 : i32
    %c0_i32_1 = arith.constant 0 : i32
    return %c0_i32, %c0_i32_0 : i32, i32
  }
  func.func @transform_2(%arg0: i32) -> (i32, i32) {
    %c0_i32 = arith.constant 0 : i32
    %c0_i32_0 = arith.constant 0 : i32
    %c0_i32_1 = arith.constant 0 : i32
    return %c0_i32, %c0_i32_0 : i32, i32
  }
  func.func @transform_3(%arg0: i32) -> (i32, i32) {
    %c0_i32 = arith.constant 0 : i32
    %c0_i32_0 = arith.constant 0 : i32
    %c0_i32_1 = arith.constant 0 : i32
    return %c0_i32, %c0_i32_0 : i32, i32
  }
  func.func @transform_4(%arg0: i32) -> (i32, i32) {
    %c0_i32 = arith.constant 0 : i32
    %c0_i32_0 = arith.constant 0 : i32
    %c0_i32_1 = arith.constant 0 : i32
    return %c0_i32, %c0_i32_0 : i32, i32
  }
  func.func @transform_5(%arg0: i32) -> (i32, i32) {
    %c0_i32 = arith.constant 0 : i32
    %c0_i32_0 = arith.constant 0 : i32
    %c0_i32_1 = arith.constant 0 : i32
    return %c0_i32, %c0_i32_0 : i32, i32
  }
  func.func @transform_6(%arg0: i32) -> (i32, i32) {
    %c0_i32 = arith.constant 0 : i32
    %c0_i32_0 = arith.constant 0 : i32
    %c0_i32_1 = arith.constant 0 : i32
    return %c0_i32, %c0_i32_0 : i32, i32
  }
  func.func @transform_7(%arg0: i32) -> (i32, i32) {
    %c0_i32 = arith.constant 0 : i32
    %c0_i32_0 = arith.constant 0 : i32
    return %arg0, %c0_i32 : i32, i32
  }
}

</mosaic_0001>

<bundles_post_ra>
// kernel: tpu_custom_call.1
= control target key start
LH: loop header
LB: loop body
LE: loop exit
PB: predicated region body
PF: predicated region fallthrough
CT: control target
= control target key end

     0   :  { %12 = vsyncpa [#allocation3], 0  ;;  %s436_s0 = inlined_call_operand.vmem [shape: f32[24,16], index: 0, kind: input, shape index: {}]   ;;  %s437_s1 = inlined_call_operand.vmem [shape: f32[16,128], index: 1, kind: input, shape index: {}]   ;;  %s438_s2 = inlined_call_operand.vmem [shape: f32[1,128], index: 2, kind: input, shape index: {}]   ;;  %s439_s3 = inlined_call_operand.hbm [shape: f32[128,128], index: 3, kind: input, shape index: {}]   ;;  %s440_s4 = inlined_call_operand.vmem [shape: f32[1,128], index: 4, kind: input, shape index: {}]   ;;  %s441_s5 = inlined_call_operand.hbm [shape: f32[128,128], index: 5, kind: input, shape index: {}]   ;;  %s442_s6 = inlined_call_operand.vmem [shape: f32[1,128], index: 6, kind: input, shape index: {}]   ;;  %s443_s7 = inlined_call_operand.hbm [shape: f32[24,128], index: 7, kind: output, shape index: {}]  }
   0x1   :  { %13 = vsyncpa [#allocation6], 0 }
   0x2   :  { %14 = vsyncpa [#allocation4], 0  ;;  %s25_s26 = sshll.u32 %s439_s3, 4  ;;  %s346_s27 = smov [#allocation2]   ;;  %s26_s26 = int_to_ptr.hbm [resolvable:$true] %s25_s26 }
   0x3   :  { %s27_s28 = sshll.u32 %s346_s27, 4  ;;  %s40_s8 = sshll.u32 %s441_s5, 4  ;;  %s28_s28 = int_to_ptr.vmem [resolvable:$true] %s27_s28  ;;  %s41_s8 = int_to_ptr.hbm [resolvable:$true] %s40_s8 }
   0x4   :  { %s347_s9 = smov 128   ;;  %s348_s10 = smov 8  }
   0x5   :  { %33 = dma.hbm_to_vmem [thread:$0]  %s26_s26, 2048, %s28_s28, [#allocation3], %s347_s9, %s347_s9, %s348_s10  }
   0x6   :  { %s349_s11 = smov [#allocation5]  }
   0x7   :  { %s42_s12 = sshll.u32 %s349_s11, 4  ;;  %s43_s12 = int_to_ptr.vmem [resolvable:$true] %s42_s12 }
   0x8   :  { %48 = dma.hbm_to_vmem [thread:$0]  %s41_s8, 2048, %s43_s12, [#allocation6], %s347_s9, %s347_s9, %s348_s10  }
   0x9   :  { %340 = dma.done.wait [#allocation3], 2048  }
   0xa   :  { %341 = vsyncadd [#allocation3], 4294965248 }
   0xb   :  { %342 = dma.done.wait [#allocation6], 2048  }
   0xc   :  { %343 = vsyncadd [#allocation6], 4294965248  ;;  %v63_v0 = vld [vmem:[%s437_s1 + $0x8] sm:$0xff]  ;;  %v62_v1 = vld [vmem:[%s437_s1] sm:$0xff]  ;;  %vm68_vm0 = vcmask 130048   ;;  %s211_s27 = sshll.u32 %s443_s7, 4  ;;  %s212_s27 = int_to_ptr.hbm [resolvable:$true] %s211_s27 }
   0xd   :  { %92 = vmatpush.msra.mxu0 %v63_v0  ;;  %v59_v2 = vld [vmem:[%s436_s0] sm:$0xff]  ;;  %v122_v3 = vld [vmem:[#allocation2 + $0x78] sm:$0xff]  ;;  %v121_v4 = vld [vmem:[#allocation2 + $0x70] sm:$0xff] }
   0xe   :  { %127 = vmatpush.msra.mxu1 %v122_v3  ;;  %228 = vmatpush.msra.mxu3 %v122_v3  ;;  %v120_v5 = vld [vmem:[#allocation2 + $0x68] sm:$0xff]  ;;  %v119_v6 = vld [vmem:[#allocation2 + $0x60] sm:$0xff]  ;;  %v118_v7 = vld [vmem:[#allocation2 + $0x58] sm:$0xff] }
   0xf   :  { %93 = vmatpush.msra.mxu0 %v62_v1  ;;  %v60_v8 = vld [vmem:[%s436_s0 + $0x8] sm:$0xff]  ;;  %v117_v9 = vld [vmem:[#allocation2 + $0x50] sm:$0xff]  ;;  %v115_v11 = vld [vmem:[#allocation2 + $0x40] sm:$0xff] }
  0x10   :  { %225 = vmatmul.msk.f32.vlgmr.msra.gmra.mxu0 %vm68_vm0, %v59_v2  ;;  %128 = vmatpush.msra.mxu1 %v121_v4  ;;  %v116_v10 = vld [vmem:[#allocation2 + $0x48] sm:$0xff]  ;;  %v114_v12 = vld [vmem:[#allocation2 + $0x38] sm:$0xff]  ;;  %v61_v13 = vld [vmem:[%s436_s0 + $0x10] sm:$0xff] }
  0x11   :  { %229 = vmatpush.msra.mxu3 %v121_v4  ;;  %v113_v14 = vld [vmem:[#allocation2 + $0x30] sm:$0xff]  ;;  %v112_v15 = vld [vmem:[#allocation2 + $0x28] sm:$0xff]  ;;  %v111_v16 = vld [vmem:[#allocation2 + $0x20] sm:$0xff] }
  0x12   :  { %129 = vmatpush.msra.mxu1 %v120_v5  ;;  %v110_v17 = vld [vmem:[#allocation2 + $0x18] sm:$0xff]  ;;  %v109_v18 = vld [vmem:[#allocation2 + $0x10] sm:$0xff]  ;;  %v108_v19 = vld [vmem:[#allocation2 + $0x8] sm:$0xff] }
  0x13   :  { %230 = vmatpush.msra.mxu3 %v120_v5  ;;  %v107_v20 = vld [vmem:[#allocation2] sm:$0xff]  ;;  %v171_v21 = vld [vmem:[#allocation5 + $0x78] sm:$0xff]  ;;  %v170_v22 = vld [vmem:[#allocation5 + $0x70] sm:$0xff] }
  0x14   :  { %130 = vmatpush.msra.mxu1 %v119_v6  ;;  %176 = vmatpush.msrb.mxu0 %v171_v21  ;;  %v169_v23 = vld [vmem:[#allocation5 + $0x68] sm:$0xff]  ;;  %v168_v24 = vld [vmem:[#allocation5 + $0x60] sm:$0xff]  ;;  %v167_v25 = vld [vmem:[#allocation5 + $0x58] sm:$0xff] }
  0x15   :  { %231 = vmatpush.msra.mxu3 %v119_v6  ;;  %244 = vmatpush.msra.mxu2 %v171_v21  ;;  %v265_v26 = vld [vmem:[%s438_s2] ss:$0 sm:$0xff]  ;;  %v166_v27 = vld [vmem:[#allocation5 + $0x50] sm:$0xff]  ;;  %v165_v28 = vld [vmem:[#allocation5 + $0x48] sm:$0xff] }
  0x16   :  { %131 = vmatpush.msra.mxu1 %v118_v7  ;;  %177 = vmatpush.msrb.mxu0 %v170_v22  ;;  %v164_v31 = vld [vmem:[#allocation5 + $0x40] sm:$0xff]  ;;  %v163_v33 = vld [vmem:[#allocation5 + $0x38] sm:$0xff]  ;;  %v162_v34 = vld [vmem:[#allocation5 + $0x30] sm:$0xff] }
  0x17   :  { %232 = vmatpush.msra.mxu3 %v118_v7  ;;  %245 = vmatpush.msra.mxu2 %v170_v22  ;;  %v161_v35 = vld [vmem:[#allocation5 + $0x28] sm:$0xff]  ;;  %v160_v38 = vld [vmem:[#allocation5 + $0x20] sm:$0xff]  ;;  %v159_v40 = vld [vmem:[#allocation5 + $0x18] sm:$0xff] }
  0x18   :  { %226 = vmatmul.msk.f32.gmra.mxu0 %vm68_vm0, %v60_v8  ;;  %132 = vmatpush.msra.mxu1 %v117_v9  ;;  %v158_v44 = vld [vmem:[#allocation5 + $0x10] sm:$0xff]  ;;  %v157_v45 = vld [vmem:[#allocation5 + $0x8] sm:$0xff]  ;;  %v156_v46 = vld [vmem:[#allocation5] sm:$0xff] }
  0x19   :  { %233 = vmatpush.msra.mxu3 %v117_v9  ;;  %178 = vmatpush.msrb.mxu0 %v169_v23  ;;  %v266_v47 = vld [vmem:[%s440_s4] ss:$0 sm:$0xff]  ;;  %s350_s4 = smov [#allocation7]  }
  0x1a   :  { %133 = vmatpush.msra.mxu1 %v116_v10  ;;  %246 = vmatpush.msra.mxu2 %v169_v23  ;;  %v267_v57 = vld [vmem:[%s442_s6] ss:$0 sm:$0xff]  ;;  %s209_s24 = sshll.u32 %s350_s4, 4  ;;  %s210_s24 = int_to_ptr.vmem [resolvable:$true] %s209_s24 }
  0x1b   :  { %234 = vmatpush.msra.mxu3 %v116_v10  ;;  %179 = vmatpush.msrb.mxu0 %v168_v24 }
  0x1c   :  { %134 = vmatpush.msra.mxu1 %v115_v11  ;;  %247 = vmatpush.msra.mxu2 %v168_v24 }
  0x1d   :  { %235 = vmatpush.msra.mxu3 %v115_v11  ;;  %180 = vmatpush.msrb.mxu0 %v167_v25 }
  0x1e   :  { %135 = vmatpush.msra.mxu1 %v114_v12  ;;  %248 = vmatpush.msra.mxu2 %v167_v25 }
  0x1f   :  { %236 = vmatpush.msra.mxu3 %v114_v12  ;;  %181 = vmatpush.msrb.mxu0 %v166_v27 }
  0x20   :  { %227 = vmatmul.msk.f32.gmra.mxu0 %vm68_vm0, %v61_v13  ;;  %136 = vmatpush.msra.mxu1 %v113_v14 }
  0x21   :  { %237 = vmatpush.msra.mxu3 %v113_v14  ;;  %249 = vmatpush.msra.mxu2 %v166_v27 }
  0x22   :  { %137 = vmatpush.msra.mxu1 %v112_v15  ;;  %182 = vmatpush.msrb.mxu0 %v165_v28 }
  0x23   :  { %238 = vmatpush.msra.mxu3 %v112_v15  ;;  %250 = vmatpush.msra.mxu2 %v165_v28 }
  0x24   :  { %138 = vmatpush.msra.mxu1 %v111_v16  ;;  %183 = vmatpush.msrb.mxu0 %v164_v31 }
  0x25   :  { %239 = vmatpush.msra.mxu3 %v111_v16  ;;  %251 = vmatpush.msra.mxu2 %v164_v31 }
  0x26   :  { %139 = vmatpush.msra.mxu1 %v110_v17  ;;  %184 = vmatpush.msrb.mxu0 %v163_v33 }
  0x27   :  { %240 = vmatpush.msra.mxu3 %v110_v17  ;;  %252 = vmatpush.msra.mxu2 %v163_v33 }
  0x28   :  { %140 = vmatpush.msra.mxu1 %v109_v18  ;;  %185 = vmatpush.msrb.mxu0 %v162_v34 }
  0x29   :  { %241 = vmatpush.msra.mxu3 %v109_v18  ;;  %253 = vmatpush.msra.mxu2 %v162_v34 }
  0x2a   :  { %141 = vmatpush.msra.mxu1 %v108_v19  ;;  %186 = vmatpush.msrb.mxu0 %v161_v35 }
  0x2b   :  { %242 = vmatpush.msra.mxu3 %v108_v19  ;;  %254 = vmatpush.msra.mxu2 %v161_v35 }
  0x2c   :  { %142 = vmatpush.msra.mxu1 %v107_v20  ;;  %187 = vmatpush.msrb.mxu0 %v160_v38 }
  0x2d   :  { %243 = vmatpush.msra.mxu3 %v107_v20  ;;  %255 = vmatpush.msra.mxu2 %v160_v38 }
  0x2e   :  { %188 = vmatpush.msrb.mxu0 %v159_v40 }
  0x2f   :  { %256 = vmatpush.msra.mxu2 %v159_v40 }
  0x30   :  { %189 = vmatpush.msrb.mxu0 %v158_v44 }
  0x31   :  { %257 = vmatpush.msra.mxu2 %v158_v44 }
  0x32   :  { %190 = vmatpush.msrb.mxu0 %v157_v45 }
  0x33   :  { %258 = vmatpush.msra.mxu2 %v157_v45 }
  0x34   :  { %191 = vmatpush.msrb.mxu0 %v156_v46 }
  0x35   :  { %259 = vmatpush.msra.mxu2 %v156_v46 }
  0x8d   :  { %v95_v29 = vpop.f32.mrf.mxu0 }
  0x8e   :  { %v96_v30 = vadd.f32 %v265_v26, %v95_v29 }
  0x90   :  { %v104_v32 = vmax.f32 %v96_v30, 0.0 }
  0x92   :  { %143 = vmatmul.f32.vlgmr.msra.gmra.mxu1 %v104_v32 }
  0x95   :  { %v98_v36 = vpop.f32.mrf.mxu0 }
  0x96   :  { %v99_v37 = vadd.f32 %v265_v26, %v98_v36 }
  0x98   :  { %v105_v39 = vmax.f32 %v99_v37, 0.0 }
  0x9a   :  { %146 = vmatmul.f32.vlgmr.msra.gmra.mxu3 %v105_v39 }
  0x9d   :  { %v101_v41 = vpop.f32.mrf.mxu0 }
  0x9e   :  { %v102_v42 = vadd.f32 %v265_v26, %v101_v41 }
  0xa0   :  { %v106_v43 = vmax.f32 %v102_v42, 0.0 }
  0xa2   :  { %149 = vmatmul.f32.gmra.mxu3 %v106_v43 }
 0x10f   :  { %v144_v48 = vpop.f32.mrf.mxu1 }
 0x110   :  { %v145_v49 = vadd.f32 %v266_v47, %v144_v48 }
 0x112   :  { %v153_v50 = vmax.f32 %v145_v49, 0.0 }
 0x114   :  { %192 = vmatmul.f32.vlgmr.msrb.gmra.mxu0 %v153_v50 }
 0x11d   :  { %v147_v51 = vpop.f32.mrf.mxu3 }
 0x11e   :  { %v148_v52 = vadd.f32 %v266_v47, %v147_v51 }
 0x120   :  { %v154_v53 = vmax.f32 %v148_v52, 0.0 }
 0x122   :  { %195 = vmatmul.f32.vlgmr.msra.gmra.mxu2 %v154_v53 }
 0x125   :  { %v150_v54 = vpop.f32.mrf.mxu3 }
 0x126   :  { %v151_v55 = vadd.f32 %v266_v47, %v150_v54 }
 0x128   :  { %v155_v56 = vmax.f32 %v151_v55, 0.0 }
 0x12a   :  { %198 = vmatmul.f32.gmra.mxu2 %v155_v56 }
 0x191   :  { %v193_v58 = vpop.f32.mrf.mxu0 }
 0x192   :  { %v194_v59 = vadd.f32 %v267_v57, %v193_v58 }
 0x194   :  { %202 = vst [vmem:[#allocation7] sm:$0xff] %v194_v59 }
 0x1a5   :  { %v196_v60 = vpop.f32.mrf.mxu2 }
 0x1a6   :  { %v197_v61 = vadd.f32 %v267_v57, %v196_v60 }
 0x1a8   :  { %203 = vst [vmem:[#allocation7 + $0x8] sm:$0xff] %v197_v61 }
 0x1ad   :  { %v199_v62 = vpop.f32.mrf.mxu2 }
 0x1ae   :  { %v200_v63 = vadd.f32 %v267_v57, %v199_v62 }
 0x1b0   :  { %204 = vst [vmem:[#allocation7 + $0x10] sm:$0xff] %v200_v63 }
 0x1b1   :  { %217 = dma.vmem_to_hbm [thread:$0]  %s210_s24, 384, %s212_s27, [#allocation4], %s347_s9, %s347_s9, %s348_s10  }
 0x1b2   :  { %344 = dma.done.wait [#allocation4], 384  }
 0x1b3   :  { %345 = vsyncadd [#allocation4], 4294966912 }
 0x1b4   :  { %222 = vsyncpa [#allocation3], 1 }
 0x1b5   :  { %223 = vsyncpa [#allocation6], 1 }
 0x1b6   :  { %224 = vsyncpa [#allocation4], 1 }

</bundles_post_ra>
